<compile_context>
chip_gen: v5e
topology: v5e:2x2
jax: 0.10.0
libtpu: 0.0.40
codegen_flags: <defaults>
</compile_context>

<pallas_src>
import math

import jax
import jax.numpy as jnp
from jax.experimental import pallas as pl
from jax.experimental.pallas import tpu as pltpu


def _gelu_new(x):
    # GPT-2 "gelu_new": 0.5*x*(1+tanh(sqrt(2/pi)*(x+0.044715*x^3)))
    c = math.sqrt(2.0 / math.pi)
    return 0.5 * x * (1.0 + jnp.tanh(c * (x + 0.044715 * x * x * x)))


def _round_up(x, m):
    return ((x + m - 1) // m) * m


def _act_backward_kernel(x_ref, wfc_ref, wproj_ref, o_ref):
    # x_ref:  (tn, E)  -- tokens on the grid axis, full embedding E on lanes
    # w*_ref: (E, E)   -- block-diagonal dense head-mix weights (resident)
    x = x_ref[...]
    hidden = jnp.dot(x, wfc_ref[...], preferred_element_type=jnp.float32)
    act = _gelu_new(hidden)                       # f32 on VPU/EUP
    out = jnp.dot(act.astype(x.dtype), wproj_ref[...],
                  preferred_element_type=jnp.float32)
    o_ref[...] = out.astype(o_ref.dtype)


def _densify(w):
    """(D, H, H) head-wise weight -> dense block-diagonal (E, E).

    M[h*D + d, k*D + d] = w[d, h, k]  (zero elsewhere).
    """
    D, H, _ = w.shape
    E = H * D
    eye = jnp.eye(D, dtype=w.dtype)
    m = jnp.einsum("dhk,de->hdke", w, eye)        # tiny, one-time host prep
    return m.reshape(E, E)


def _vmem_limit_bytes():
    # ~75% of physical VMEM, capped at 96 MiB (v5e/v6e have 128 MiB, v7x 64 MiB).
    try:
        phys = pltpu.get_tpu_info().vmem_capacity_bytes
    except Exception:
        phys = 64 * 1024 * 1024
    return int(min(0.75 * phys, 96 * 1024 * 1024))


def _choose_token_tile(N, E, act_bytes, w_bytes_per_el, vmem_limit, tn_req):
    """Pick a token-tile size that fits scoped VMEM (with padding/temporaries)."""
    E_lane = _round_up(E, 128)
    sub = 8 if w_bytes_per_el >= 4 else (16 if w_bytes_per_el == 2 else 32)
    E_sub = _round_up(E, sub)
    # 2 resident weights, double-buffered by the pipeline.
    w_bytes = 2 * 2 * E_sub * E_lane * w_bytes_per_el
    # Per token row: in + out blocks (double-buffered) + ~3 f32 intermediates
    # (hidden / act / out) created inside the kernel.
    per_row = E_lane * (2 * 2 * act_bytes + 3 * 4)
    budget = int(0.8 * vmem_limit) - w_bytes      # headroom for compiler scratch
    rows = max(8, budget // max(per_row, 1))

    if N <= 8:
        return max(1, N)

    tn = int(min(tn_req, rows, N))
    tn = max(8, (tn // 8) * 8)

    # Ensure the single "parallel" grid axis has >= 2 steps (v7x megacore).
    if tn >= N and N >= 16:
        tn = max(8, ((-(-N // 2)) // 8) * 8)

    # Prefer a tile that divides N (avoid a ragged masked tail block).
    if N % tn:
        for cand in range(tn, max(8, tn // 2) - 1, -8):
            if N % cand == 0:
                tn = cand
                break
    return tn


def activation_backward(hidden_states, w_fc, w_proj, *, tn=2048):
    """hidden_states: (B, S, E) with E = H * D. w_fc/w_proj: (D, H, H)."""
    B, S, E = hidden_states.shape
    D, H, H2 = w_fc.shape
    assert H == H2 and H * D == E
    N = B * S

    compute_dtype = hidden_states.dtype
    # One-time host-side weight densification (tiny; E x E block-diagonal).
    wfc_dense = _densify(w_fc).astype(compute_dtype)
    wproj_dense = _densify(w_proj).astype(compute_dtype)

    vmem_limit = _vmem_limit_bytes()
    act_bytes = jnp.dtype(compute_dtype).itemsize
    tn = _choose_token_tile(N, E, act_bytes, act_bytes, vmem_limit, tn)
    grid_n = pl.cdiv(N, tn)

    # Free reshape: tokens x embedding, E contiguous on lanes.
    x = hidden_states.reshape(N, E)

    out = pl.pallas_call(
        _act_backward_kernel,
        out_shape=jax.ShapeDtypeStruct((N, E), compute_dtype),
        grid_spec=pltpu.PrefetchScalarGridSpec(
            num_scalar_prefetch=0,
            grid=(grid_n,),
            in_specs=[
                pl.BlockSpec((tn, E), lambda i: (i, 0)),
                pl.BlockSpec((E, E), lambda i: (0, 0)),
                pl.BlockSpec((E, E), lambda i: (0, 0)),
            ],
            out_specs=pl.BlockSpec((tn, E), lambda i: (i, 0)),
        ),
        compiler_params=pltpu.CompilerParams(
            dimension_semantics=("parallel",),
            vmem_limit_bytes=vmem_limit,
        ),
    )(x, wfc_dense, wproj_dense)

    # Free reshape back to (B, S, E).
    return out.reshape(B, S, E)


def build_activation_backward_weights(head_dim, num_heads, din, memory_index,
                                      scale_embeddings, retain_og_act=False):
    """Deterministic init matching ActivationBackward.__init__."""
    assert memory_index == -1 or memory_index >= din
    assert din % head_dim == 0
    assert memory_index % head_dim == 0  # mirrors the torch module's assert
    n_part = din // head_dim
    mem = memory_index // head_dim
    eye = jnp.eye(n_part, dtype=jnp.float32)

    c_fc = jnp.zeros((head_dim, num_heads, num_heads), jnp.float32)
    c_fc = c_fc.at[:, 0:n_part, 0:n_part].set(eye / scale_embeddings)
    c_fc = c_fc.at[:, 0:n_part, mem:mem + n_part].set(eye)
    c_fc = c_fc.at[:, mem:mem + n_part, mem:mem + n_part].set(eye)

    c_proj = jnp.zeros((head_dim, num_heads, num_heads), jnp.float32)
    c_proj = c_proj.at[:, 0:n_part, 0:n_part].set(scale_embeddings * eye)
    c_proj = c_proj.at[:, 0:n_part, mem:mem + n_part].set(-scale_embeddings * eye)
    if retain_og_act:
        c_proj = c_proj.at[:, mem:mem + n_part, mem:mem + n_part].set(eye)

    # torch: weight = swapaxes(init, -1, -2)  => (D, in_head, out_head)
    w_fc = jnp.swapaxes(c_fc, -1, -2)
    w_proj = jnp.swapaxes(c_proj, -1, -2)
    return w_fc, w_proj


def _reference(hidden_states, w_fc, w_proj):
    B, S, E = hidden_states.shape
    D, H, _ = w_fc.shape
    x = hidden_states.reshape(B, S, H, D)
    h = jnp.einsum("bshd,dhk->bskd", x, w_fc)
    a = _gelu_new(h)
    y = jnp.einsum("bshd,dhk->bskd", a, w_proj)
    return y.reshape(B, S, E)


if __name__ == "__main__":
    # small config consistent with the module
    hidden_size = 32
    num_heads = 8
    head_dim = hidden_size // num_heads        # 4
    din = 8                                    # multiple of head_dim
    memory_index = 16                          # >= din, multiple of head_dim
    scale_embeddings = 4.0
    B, S = 2, 8

    w_fc, w_proj = build_activation_backward_weights(
        head_dim, num_heads, din, memory_index, scale_embeddings,
        retain_og_act=False)

    key = jax.random.PRNGKey(0)
    hidden_states = jax.random.normal(key, (B, S, hidden_size), dtype=jnp.float32)

    out = activation_backward(hidden_states, w_fc, w_proj)
    out = jax.block_until_ready(out)

    ref = _reference(hidden_states, w_fc, w_proj)
    assert out.shape == (B, S, hidden_size)
    assert jnp.allclose(out, ref, atol=1e-4, rtol=1e-5)

    print("KERNEL_OK")
</pallas_src>

<mosaic_0001>
module attributes {stable_mosaic.version = 11 : i64} {
  func.func @_act_backward_kernel(%arg0: i32, %arg1: memref<8x32xf32, #tpu.memory_space<vmem>>, %arg2: memref<32x32xf32, #tpu.memory_space<vmem>>, %arg3: memref<32x32xf32, #tpu.memory_space<vmem>>, %arg4: memref<8x32xf32, #tpu.memory_space<vmem>>) attributes {dimension_semantics = [#tpu.dimension_semantics<parallel>], iteration_bounds = array<i64: 2>, scalar_prefetch = 0 : i64, scratch_operands = 0 : i64, tpu.core_type = #tpu.core_type<tc>, window_params = [{transform_indices = @transform_0, window_bounds = array<i64: 8, 32>}, {pipeline_mode = #tpu.pipeline_mode<synchronous>, transform_indices = @transform_1, window_bounds = array<i64: 32, 32>}, {pipeline_mode = #tpu.pipeline_mode<synchronous>, transform_indices = @transform_2, window_bounds = array<i64: 32, 32>}, {transform_indices = @transform_3, window_bounds = array<i64: 8, 32>}]} {
    %c0 = arith.constant 0 : index
    %c0_0 = arith.constant 0 : index
    %0 = vector.load %arg1[%c0, %c0_0] : memref<8x32xf32, #tpu.memory_space<vmem>>, vector<8x32xf32>
    %c0_1 = arith.constant 0 : index
    %c0_2 = arith.constant 0 : index
    %1 = vector.load %arg2[%c0_1, %c0_2] : memref<32x32xf32, #tpu.memory_space<vmem>>, vector<32x32xf32>
    %cst = arith.constant dense<0.000000e+00> : vector<8x32xf32>
    %2 = tpu.matmul %0, %1, %cst {dimension_numbers = #tpu.dot_dimension_numbers<[1], [0], [0], [1], [0, 0, 1, 1], [], []>} : vector<8x32xf32>, vector<32x32xf32>, vector<8x32xf32> -> vector<8x32xf32>
    %cst_3 = arith.constant 5.000000e-01 : f32
    %3 = vector.broadcast %cst_3 : f32 to vector<8x32xf32>
    %4 = arith.mulf %3, %2 : vector<8x32xf32>
    %cst_4 = arith.constant 4.471500e-02 : f32
    %5 = vector.broadcast %cst_4 : f32 to vector<8x32xf32>
    %6 = arith.mulf %5, %2 : vector<8x32xf32>
    %7 = arith.mulf %6, %2 : vector<8x32xf32>
    %8 = arith.mulf %7, %2 : vector<8x32xf32>
    %9 = arith.addf %2, %8 : vector<8x32xf32>
    %cst_5 = arith.constant 0.797884583 : f32
    %10 = vector.broadcast %cst_5 : f32 to vector<8x32xf32>
    %11 = arith.mulf %10, %9 : vector<8x32xf32>
    %12 = math.tanh %11 : vector<8x32xf32>
    %cst_6 = arith.constant 1.000000e+00 : f32
    %13 = vector.broadcast %cst_6 : f32 to vector<8x32xf32>
    %14 = arith.addf %13, %12 : vector<8x32xf32>
    %15 = arith.mulf %4, %14 : vector<8x32xf32>
    %c0_7 = arith.constant 0 : index
    %c0_8 = arith.constant 0 : index
    %16 = vector.load %arg3[%c0_7, %c0_8] : memref<32x32xf32, #tpu.memory_space<vmem>>, vector<32x32xf32>
    %cst_9 = arith.constant dense<0.000000e+00> : vector<8x32xf32>
    %17 = tpu.matmul %15, %16, %cst_9 {dimension_numbers = #tpu.dot_dimension_numbers<[1], [0], [0], [1], [0, 0, 1, 1], [], []>} : vector<8x32xf32>, vector<32x32xf32>, vector<8x32xf32> -> vector<8x32xf32>
    %c0_10 = arith.constant 0 : index
    %c0_11 = arith.constant 0 : index
    %18 = vector.load %arg4[%c0_10, %c0_11] : memref<8x32xf32, #tpu.memory_space<vmem>>, vector<8x32xf32>
    tpu.vector_store %arg4[%c0_10, %c0_11], %17 {strides = array<i32>} : memref<8x32xf32, #tpu.memory_space<vmem>>, vector<8x32xf32>,
    return
  }
  func.func @transform_0(%arg0: i32) -> (i32, i32) {
    %c0_i32 = arith.constant 0 : i32
    %c0_i32_0 = arith.constant 0 : i32
    return %arg0, %c0_i32 : i32, i32
  }
  func.func @transform_1(%arg0: i32) -> (i32, i32) {
    %c0_i32 = arith.constant 0 : i32
    %c0_i32_0 = arith.constant 0 : i32
    %c0_i32_1 = arith.constant 0 : i32
    return %c0_i32, %c0_i32_0 : i32, i32
  }
  func.func @transform_2(%arg0: i32) -> (i32, i32) {
    %c0_i32 = arith.constant 0 : i32
    %c0_i32_0 = arith.constant 0 : i32
    %c0_i32_1 = arith.constant 0 : i32
    return %c0_i32, %c0_i32_0 : i32, i32
  }
  func.func @transform_3(%arg0: i32) -> (i32, i32) {
    %c0_i32 = arith.constant 0 : i32
    %c0_i32_0 = arith.constant 0 : i32
    return %arg0, %c0_i32 : i32, i32
  }
}

</mosaic_0001>

<bundles_post_ra>
// kernel: tpu_custom_call.1
= control target key start
LH: loop header
LB: loop body
LE: loop exit
PB: predicated region body
PF: predicated region fallthrough
CT: control target
= control target key end

     0   :  { %8 = vsyncpa [#allocation3], 0  ;;  %s819_s0 = inlined_call_operand.hbm [shape: f32[16,32], index: 0, kind: input, shape index: {}]   ;;  %s820_s1 = inlined_call_operand.hbm [shape: f32[32,32], index: 1, kind: input, shape index: {}]   ;;  %s821_s2 = inlined_call_operand.hbm [shape: f32[32,32], index: 2, kind: input, shape index: {}]   ;;  %s822_s3 = inlined_call_operand.hbm [shape: f32[16,32], index: 3, kind: output, shape index: {}]  }
   0x1   :  { %10 = vsyncpa [#allocation3 + $0x1], 0 }
   0x2   :  { %11 = vsyncpa [#allocation6], 0 }
   0x3   :  { %12 = vsyncpa [#allocation4], 0 }
   0x4   :  { %14 = vsyncpa [#allocation4 + $0x1], 0  ;;  %s667_s12 = smov 0   ;;  %s669_s13 = smov 0  }
   0x5   :  { %s671_s14 = smov 0   ;;  %s673_s15 = smov 0  }
   0x6 LB: > { %s130_s18 = sshll.u32 %s820_s1, 4  ;;  %s691_s19 = sadd.s32 4294967295, %s641_s15   ;;  %s641_s15 = sphi %s673_s15, %s833_s15   ;;  %s637_s14 = sphi %s671_s14, %s832_s14   ;;  %s633_s13 = sphi %s669_s13, %s831_s13   ;;  %s629_s12 = sphi %s667_s12, %s830_s12   ;;  %s131_s18 = int_to_ptr.hbm [resolvable:$true] %s130_s18 }
   0x7   : > { %p393_p0 = scmp.ge.s32.totalorder %s641_s15, 1  ;;  %p41_p1 = scmp.eq.s32.totalorder %s691_s19, 0 }
   0x8   : > { %p119_p2 = scmp.lt.s32.totalorder %s641_s15, 3  ;;  %s643_s21 = smov [#allocation5]  }
   0x9   : > { %s132_s22 = sshll.u32 %s643_s21, 4  ;;  %s144_s25 = sshll.u32 %s821_s2, 4  ;;  %s133_s22 = int_to_ptr.vmem [resolvable:$true] %s132_s22  ;;  %s145_s25 = int_to_ptr.hbm [resolvable:$true] %s144_s25 }
   0xa   : > { %p696_p3 = pnand %p393_p0, %p119_p2  ;;  %s644_s26 = smov [#allocation7]  }
   0xb   : > { %s146_s27 = sshll.u32 %s644_s26, 4  ;;  %s645_s28 = smov 128   ;;  %s147_s27 = int_to_ptr.vmem [resolvable:$true] %s146_s27 }
   0xc   : > { %p422_p4 = pneg %p696_p3  ;;  %s646_s29 = smov 8  }
   0xd   : > { %s392_s30 = sadd.s32 4294967294, %s641_s15   ;;  %s710_s4 = sadd.s32 1, %s641_s15  }
   0xe   : > { %p423_p6 = pnand %p422_p4, %p41_p1  ;;  %s24_s5 = ssub.s32 %s641_s15, %s710_s4 }
   0xf   : > { %s27_s6 = sadd.s32 1, %s637_s14  ;;  %p25_p7 = scmp.eq.s32.totalorder %s24_s5, 0 }
  0x10   : > { %425 = dma.hbm_to_vmem [thread:$0]  (!%p423_p6), %s131_s18, 512, %s133_s22, [#allocation6], %s645_s28, %s645_s28, %s646_s29  }
  0x11   : > { %428 = dma.hbm_to_vmem [thread:$0]  (!%p423_p6), %s145_s25, 512, %s147_s27, [#allocation6], %s645_s28, %s645_s28, %s646_s29  }
  0x12   : > { %p34_p8 = scmp.ne.s32.totalorder %s637_s14, %s633_s13  ;;  %p35_p9 = scmp.eq.s32.totalorder %s641_s15, 0 }
  0x13   : > { %p40_p10 = scmp.ne.s32.totalorder %s633_s13, %s629_s12  ;;  %p106_p13 = scmp.eq.s32.totalorder %s691_s19, 1 }
  0x14   : > { %s721_s7 = scalar_select %p25_p7, %s637_s14, %s27_s6  }
  0x15   : > { %p723_p11 = por %p35_p9, %p34_p8  ;;  %p729_p12 = por %p41_p1, %p40_p10 }
  0x16   : > { %p112_p0 = scmp.eq.s32.totalorder %s392_s30, 1  ;;  %p439_p2 = scmp.lt.s32.totalorder %s641_s15, 2 }
  0x17   : > { %s160_s10 = sand.u32 1, %s637_s14   ;;  %p736_p4 = por %p106_p13, %p34_p8 }
  0x18   : > { %p740_p6 = por %p112_p0, %p40_p10  ;;  %s397_s17 = sshll.u32 %s160_s10, 3 }
  0x19   : > { %s398_s18 = sshll.u32 %s641_s15, 3  ;;  %s164_s24 = scalar_lea.vmem [#allocation2], %s397_s17 }
  0x1a   : > { %s168_s23 = scalar_lea.hbm %s819_s0, %s398_s18  ;;  %s172_s25 = sshll.u32 %s164_s24, 4  ;;  %s173_s25 = int_to_ptr.vmem [resolvable:$true] %s172_s25 }
  0x1b   : > { %s170_s26 = sshll.u32 %s168_s23, 4  ;;  %p750_p7 = pnand %p439_p2, %p723_p11  ;;  %s171_s26 = int_to_ptr.hbm [resolvable:$true] %s170_s26 }
  0x1c   : > { %s161_s28 = scalar_lea.sflag [#allocation3], %s160_s10  ;;  %s541_s29 = sshra.s32 %s171_s26, 4  ;;  %s542_s29 = int_to_ptr.hbm [resolvable:$true] %s541_s29 }
  0x1d   : > { %s543_s30 = scalar_lea.hbm %s542_s29, 8  ;;  %p545_p9 = pneg %p750_p7 }
  0x1e   : > { %p544_p8 = scmp.ne.s32.totalorder %s542_s29, %s543_s30  ;;  %s548_s17 = scalar_lea.hbm %s819_s0, 16 }
  0x1f   : > { %p549_p11 = scmp.lt.s32.totalorder %s542_s29, %s819_s0  ;;  %p550_p0 = scmp.lt.s32.totalorder %s548_s17, %s543_s30 }
  0x20   : > { %p546_p10 = pnand %p545_p9, %p544_p8 }
  0x21   : > { %p551_p2 = por %p550_p0, %p549_p11 }
  0x22   : > { %p547_p13 = pneg %p546_p10 }
  0x24   : > { %p552_p5 = pnand %p551_p2, %p547_p13 }
  0x26   : > { %555 = shalt.err (!%p552_p5)
}
  0x27   : > { %432 = dma.hbm_to_vmem [thread:$0]  (!%p750_p7), %s171_s26, 128, %s173_s25, %s161_s28  }
  0x28   : > { %181 = sbr.rel (%p696_p3) target bundleno = 332 (0x14c), region = 32  ;;  %s767_s10 = sand.u32 (!%p696_p3), 1, %s633_s13  }
  0x29   : > { %s400_s21 = sshll.u32 (!%p696_p3), %s767_s10, 3  ;;  %s184_s22 = scalar_lea.sflag (!%p696_p3), [#allocation3], %s767_s10 }
  0x2a   : > { %s187_s23 = scalar_lea.vmem (!%p696_p3), [#allocation2], %s400_s21 }
  0x2d   : > { %616 = dma.done.wait (%p729_p12), %s184_s22, 128  }
  0x2e   : > { %618 = vsyncadd (%p729_p12), %s184_s22, 4294967168 }
  0x2f   : > { %620 = dma.done.wait (%p41_p1), [#allocation6], 1024  }
  0x30   : > { %622 = vsyncadd (%p41_p1), [#allocation6], 4294966272  ;;  %v225_v0 = vld [vmem:[#allocation5 + $0x18] sm:$0xff]  ;;  %v224_v1 = vld [vmem:[#allocation5 + $0x10] sm:$0xff]  ;;  %vm226_vm0 = vcmask 261120   ;;  %s407_s20 = sshll.u32 %s691_s19, 3 }
  0x31   : > { %242 = vmatpush.msra.mxu0 %v225_v0  ;;  %v223_v2 = vld [vmem:[#allocation5 + $0x8] sm:$0xff]  ;;  %v222_v3 = vld [vmem:[#allocation5] sm:$0xff]  ;;  %v221_v4 = vld [vmem:[%s187_s23] sm:$0xff]  ;;  %s298_s25 = scalar_lea.hbm %s822_s3, %s407_s20  ;;  %s220_s26 = scalar_lea.vmem [#allocation8], %s400_s21 }
  0x32   : > { %v262_v5 = vld [vmem:[#allocation7 + $0x18] sm:$0xff]  ;;  %v261_v6 = vld [vmem:[#allocation7 + $0x10] sm:$0xff]  ;;  %v260_v7 = vld [vmem:[#allocation7 + $0x8] sm:$0xff]  ;;  %s300_s27 = sshll.u32 %s220_s26, 4  ;;  %s302_s28 = sshll.u32 %s298_s25, 4  ;;  %s301_s27 = int_to_ptr.vmem [resolvable:$true] %s300_s27  ;;  %s303_s28 = int_to_ptr.hbm [resolvable:$true] %s302_s28 }
  0x33   : > { %243 = vmatpush.msra.mxu0 %v224_v1  ;;  %278 = vmatpush.msra.mxu1 %v262_v5  ;;  %v259_v8 = vld [vmem:[#allocation7] sm:$0xff]  ;;  %s288_s29 = scalar_lea.sflag [#allocation4], %s767_s10  ;;  %s585_s30 = sshra.s32 %s303_s28, 4  ;;  %s586_s30 = int_to_ptr.hbm [resolvable:$true] %s585_s30 }
  0x34   : > { %s587_s5 = scalar_lea.hbm %s586_s30, 8  ;;  %s591_s17 = scalar_lea.hbm %s822_s3, 16 }
  0x35   : > { %244 = vmatpush.msra.mxu0 %v223_v2  ;;  %279 = vmatpush.msra.mxu1 %v261_v6  ;;  %p588_p1 = scmp.ne.s32.totalorder %s586_s30, %s587_s5  ;;  %p592_p12 = scmp.lt.s32.totalorder %s586_s30, %s822_s3 }
  0x36   : > { %p593_p7 = scmp.lt.s32.totalorder %s591_s17, %s587_s5 }
  0x37   : > { %245 = vmatpush.msra.mxu0 %v222_v3  ;;  %280 = vmatpush.msra.mxu1 %v260_v7  ;;  %p589_p3 = pnand %p588_p1, %p736_p4 }
  0x38   : > { %404 = vmatmul.msk.f32.vlgmr.msra.gmra.mxu0 %vm226_vm0, %v221_v4  ;;  %p594_p8 = por %p593_p7, %p592_p12 }
  0x39   : > { %281 = vmatpush.msra.mxu1 %v259_v8  ;;  %p590_p5 = pneg %p589_p3 }
  0x3b   : > { %p595_p9 = pnand %p594_p8, %p590_p5 }
  0xb5   : > { %v247_v9 = vpop.f32.mrf.mxu0 }
  0xb6   : > { %v251_v10 = vmul.f32 0.044715, %v247_v9  ;;  %v250_v16 = vmul.f32 0.5, %v247_v9 }
  0xb8   : > { %v252_v11 = vmul.f32 %v251_v10, %v247_v9 }
  0xba   : > { %v253_v12 = vmul.f32 %v252_v11, %v247_v9 }
  0xbc   : > { %v254_v13 = vadd.f32 %v253_v12, %v247_v9 }
  0xbe   : > { %v255_v14 = vmul.f32 0.7978846, %v254_v13 }
  0xc0   : > { %479 = vtanh.f32 %v255_v14 }
  0xc6   : > { %v480_v15 = vpop.eup %479 }
  0xc7   : > { %v257_v17 = vadd.f32 1.0, %v480_v15 }
  0xc9   : > { %v258_v18 = vmul.f32 %v257_v17, %v250_v16 }
  0xcb   : > { %405 = vmatmul.msk.f32.vlgmr.msra.gmra.mxu1 %vm226_vm0, %v258_v18 }
 0x148   : > { %v283_v19 = vpop.f32.mrf.mxu1 }
 0x149   : > { %286 = vst.msk [vmem:[%s220_s26] sm:$0xff] %vm226_vm0, %v283_v19 }
 0x14a   : > { %598 = shalt.err (!%p595_p9)
}
 0x14b   : > { %420 = dma.vmem_to_hbm [thread:$0]  (%p736_p4), %s301_s27, 128, %s303_s28, %s288_s29  }
 0x14c PF: > { %s314_s10 = sand.u32 1, %s629_s12   ;;  %p829_p10 = scmp.ge.s32.totalorder %s641_s15, 2 }
 0x14d   : > { %s315_s21 = scalar_lea.sflag [#allocation4], %s314_s10 }
 0x14e   : > { %p434_p13 = pnand %p829_p10, %p740_p6 }
 0x150   : > { %p435_p11 = pneg %p434_p13 }
 0x152   : > { %624 = dma.done.wait (%p435_p11), %s315_s21, 128  }
 0x153   : > { %626 = vsyncadd (%p435_p11), %s315_s21, 4294967168  ;;  %p17_p0 = scmp.ge.s32.totalorder %s710_s4, 4   ;;  %s830_s12 = smov %s633_s13 }
 0x154   : > { %s831_s13 = smov %s637_s14  ;;  %s832_s14 = smov %s721_s7 }
 0x155   : > { %s833_s15 = smov %s710_s4  ;;  %19 = sbr.rel (!%p17_p0) target bundleno = 6 (0x6), region = 85 }
 0x15a   :  { %321 = vsyncpa [#allocation3], 1 }
 0x15b   :  { %323 = vsyncpa [#allocation3 + $0x1], 1 }
 0x15c   :  { %324 = vsyncpa [#allocation6], 1 }
 0x15d   :  { %325 = vsyncpa [#allocation4], 1 }
 0x15e   :  { %327 = vsyncpa [#allocation4 + $0x1], 1 }

</bundles_post_ra>
